<compile_context>
chip_gen: v7x
topology: tpu7x:2x2x1
jax: 0.10.0
libtpu: 0.0.40
codegen_flags: <defaults>
</compile_context>

<pallas_src>
import functools

import jax
import jax.numpy as jnp
from jax.experimental import pallas as pl
from jax.experimental.pallas import tpu as pltpu


_CHUNKED_COPY_MIN_BYTES = 1 << 20   # below this, a single DMA is cheaper
_MAX_COPY_CHUNKS = 8                # concurrently outstanding DMAs for big copies


# -----------------------------------------------------------------------------
# Zero-copy identity: exact nn.Identity.forward semantics, no kernel launch.
# -----------------------------------------------------------------------------
def identity(x):
    """Return the input (what nn.Identity.forward does). Zero-copy, no pallas_call."""
    return x


# -----------------------------------------------------------------------------
# Fresh-buffer identity: direct HBM->HBM DMA (no VMEM round trip).
# -----------------------------------------------------------------------------
def _identity_dma_kernel(x_hbm, o_hbm, sem):
    # One DMA descriptor: HBM read + HBM write, the architectural floor for a copy.
    cp = pltpu.make_async_copy(x_hbm, o_hbm, sem)
    cp.start()
    cp.wait()


def _identity_dma_chunked_kernel(x_hbm, o_hbm, sem, *, num_chunks, chunk_rows):
    # K independent DMAs along the leading dim, all in flight simultaneously
    # (per-slot semaphores), then wait on all of them.
    copies = []
    for k in range(num_chunks):
        rows = pl.ds(k * chunk_rows, chunk_rows)
        cp = pltpu.make_async_copy(x_hbm.at[rows], o_hbm.at[rows], sem.at[k])
        cp.start()
        copies.append(cp)
    for cp in copies:
        cp.wait()


def _pick_num_chunks(dim0):
    for k in range(min(_MAX_COPY_CHUNKS, dim0), 0, -1):
        if dim0 % k == 0:
            return k
    return 1


def identity_copy(x):
    """Identity that materializes a fresh output buffer via direct HBM->HBM DMA."""
    nbytes = x.size * x.dtype.itemsize
    num_chunks = _pick_num_chunks(x.shape[0]) if x.ndim >= 1 else 1
    use_chunked = nbytes >= _CHUNKED_COPY_MIN_BYTES and num_chunks > 1

    if use_chunked:
        kernel = functools.partial(
            _identity_dma_chunked_kernel,
            num_chunks=num_chunks,
            chunk_rows=x.shape[0] // num_chunks,
        )
        scratch = [pltpu.SemaphoreType.DMA((num_chunks,))]
    else:
        kernel = _identity_dma_kernel
        scratch = [pltpu.SemaphoreType.DMA(())]

    return pl.pallas_call(
        kernel,
        out_shape=jax.ShapeDtypeStruct(x.shape, x.dtype),
        in_specs=[pl.BlockSpec(memory_space=pl.ANY)],   # raw HBM ref, no auto-DMA
        out_specs=pl.BlockSpec(memory_space=pl.ANY),
        scratch_shapes=scratch,
    )(x)


if __name__ == "__main__":
    key = jax.random.PRNGKey(0)
    k_small, k_big = jax.random.split(key)

    # Small NCHW-like input consistent with how Identity is typically used.
    x = jax.random.normal(k_small, (2, 4, 16, 16), dtype=jnp.float32)

    # Zero-copy path (exact module semantics).
    y = identity(x)
    jax.block_until_ready(y)
    assert y.shape == x.shape and y.dtype == x.dtype
    assert bool(jnp.all(y == x))

    # Pallas fresh-buffer path, small input -> single HBM->HBM DMA.
    z = identity_copy(x)
    jax.block_until_ready(z)
    assert z.shape == x.shape and z.dtype == x.dtype
    assert bool(jnp.all(z == x))

    # Pallas fresh-buffer path, >=1 MiB input -> chunked concurrent DMAs.
    big = jax.random.normal(k_big, (512, 1024), dtype=jnp.float32)  # 2 MiB
    w = identity_copy(big)
    jax.block_until_ready(w)
    assert w.shape == big.shape and w.dtype == big.dtype
    assert bool(jnp.all(w == big))

    print("KERNEL_OK")
</pallas_src>

<mosaic_0001>
module attributes {stable_mosaic.version = 11 : i64} {
  func.func @_identity_dma_kernel(%arg0: memref<2x4x16x16xf32, #tpu.memory_space<any>>, %arg1: memref<2x4x16x16xf32, #tpu.memory_space<any>>, %arg2: memref<!tpu.dma_semaphore, #tpu.memory_space<semaphore_mem>>) attributes {dimension_semantics = [], scalar_prefetch = 0 : i64, scratch_operands = 1 : i64, tpu.core_type = #tpu.core_type<tc>} {
    tpu.enqueue_dma source(%arg0 : memref<2x4x16x16xf32, #tpu.memory_space<any>>) target(%arg1 : memref<2x4x16x16xf32, #tpu.memory_space<any>>) target_semaphore(%arg2 : memref<!tpu.dma_semaphore, #tpu.memory_space<semaphore_mem>>)
    tpu.wait_dma2 semaphore(%arg2 : memref<!tpu.dma_semaphore, #tpu.memory_space<semaphore_mem>>) src(%arg0 : memref<2x4x16x16xf32, #tpu.memory_space<any>>) dst(%arg1 : memref<2x4x16x16xf32, #tpu.memory_space<any>>)
    return
  }
}

</mosaic_0001>

<bundles_post_ra>
// kernel: tpu_custom_call.1
= control target key start
LH: loop header
LB: loop body
LE: loop exit
PB: predicated region body
PF: predicated region fallthrough
CT: control target
= control target key end

     0   :  { %s36_s6 = smov [#allocation2]   ;;  %s37_s7 = smov [#allocation3]   ;;  %s55_s0 = inlined_call_operand.hbm [shape: f32[2,4,16,16], index: 0, kind: input, shape index: {}]   ;;  %s56_s1 = inlined_call_operand.hbm [shape: f32[2,4,16,16], index: 1, kind: output, shape index: {}]  }
   0x1   :  { %s38_s8 = smov 0  }
   0x2   :  { %18 = dma.general %s55_s0, 2048, %s56_s1, %s36_s6, %s37_s7, [#allocation4], %s38_s8, 0  }
   0x3   :  { %34 = dma.done.wait [#allocation2], 2048 }
   0x4   :  { %35 = vsyncadd [#allocation2], 4294965248 }
   0x5   :  { %24 = vsyncmov [#allocation2] }
   0x8   :  { %s25_s13 = vpop.sfrf %24 }
   0x9   :  { %p30_p0 = scmp.ne.s32.totalorder %s25_s13, 0 }
   0xb   :  { %29 = shalt.err (%p30_p0)  }

</bundles_post_ra>
